<compile_context>
chip_gen: v7x
topology: tpu7x:2x2x1
jax: 0.10.0
libtpu: 0.0.40
codegen_flags: <defaults>
</compile_context>

<pallas_src>
import functools

import jax
import jax.numpy as jnp
from jax.experimental import pallas as pl
from jax.experimental.pallas import tpu as pltpu

IGNORE_LABEL = -1
NUM_OUTPUTS = 1            # config.MODEL.NUM_OUTPUTS
BALANCE_WEIGHTS = (1.0,)   # config.LOSS.BALANCE_WEIGHTS
ALIGN_CORNERS = False      # config.MODEL.ALIGN_CORNERS

VMEM_TILE_BUDGET_BYTES = 20 * 1024 * 1024   # double-buffered blocks + scratch
VMEM_LIMIT_BYTES = 32 * 1024 * 1024         # raises v5e's 16 MiB scoped default
MAX_ROWS_PER_TILE = 4096                    # 4096*128 = 512K pixels/step cap


def _round_up(x, m):
    return (x + m - 1) // m * m


def _cdiv(a, b):
    return (a + b - 1) // b


def _pick_rows(num_classes, itemsize, total_rows, max_rows=None):
    """Rows (of 128 pixels) per grid step, sized against the VMEM budget."""
    per_row_bytes = 128 * (2 * num_classes * itemsize   # logits, double-buffered
                           + 2 * 4                      # labels, double-buffered
                           + 2 * 4)                     # f32 sum/cnt accumulators
    rows = int(VMEM_TILE_BUDGET_BYTES // per_row_bytes)
    rows = min(rows, MAX_ROWS_PER_TILE)
    if max_rows is not None:
        rows = min(rows, max_rows)
    if rows >= total_rows:
        return total_rows                   # single tile: full-dim block is legal
    return max(8, rows - rows % 8)          # otherwise keep sublane-aligned


def _ce_kernel(logits_ref, target_ref, sum_ref, cnt_ref, acc_sum, acc_cnt, *,
               ignore_label, num_classes, total_rows, rows_per_tile,
               tiles_per_split, needs_tail_mask):
    """One (batch, split, row-tile) step of masked softmax cross-entropy.

    logits_ref: (1, C, ROWS, 128)  logits; pixels dense on sublanes+lanes.
    target_ref: (1, ROWS, 128)     int32 labels (ignore_label = masked out).
    sum_ref / cnt_ref: (1, 1, 1, 1) per-(image, split) loss sum / valid count.
    acc_sum / acc_cnt: (ROWS, 128) f32 dense accumulators (pure VPU adds).
    """
    t = pl.program_id(2)

    @pl.when(t == 0)
    def _():
        acc_sum[...] = jnp.zeros_like(acc_sum)
        acc_cnt[...] = jnp.zeros_like(acc_cnt)

    tgt = target_ref[0]                                  # (ROWS, 128) int32

    valid = tgt != ignore_label
    if needs_tail_mask:
        # Only emitted when the last row tile is ragged (trace-time choice).
        tile_idx = pl.program_id(1) * tiles_per_split + t
        row = tile_idx * rows_per_tile + jax.lax.broadcasted_iota(
            jnp.int32, tgt.shape, 0)
        valid = valid & (row < total_rows)

    # ---- unrolled class loop (elementwise only; no sublane reductions) ----
    # pass 1: running max over classes
    x0 = logits_ref[0, 0].astype(jnp.float32)            # (ROWS, 128)
    m = x0
    for c in range(1, num_classes):
        m = jnp.maximum(m, logits_ref[0, c].astype(jnp.float32))

    # pass 2: sum-exp + fused target-logit gather
    sum_exp = jnp.exp(x0 - m)
    tgt_logit = jnp.where(tgt == 0, x0, 0.0)
    for c in range(1, num_classes):
        xc = logits_ref[0, c].astype(jnp.float32)
        sum_exp = sum_exp + jnp.exp(xc - m)
        tgt_logit = jnp.where(tgt == c, xc, tgt_logit)

    nll = jnp.log(sum_exp) + m - tgt_logit               # per-pixel NLL

    # jnp.where is a select, so garbage in out-of-range rows cannot leak NaNs.
    acc_sum[...] += jnp.where(valid, nll, 0.0)
    acc_cnt[...] += valid.astype(jnp.float32)

    @pl.when(t == pl.num_programs(2) - 1)
    def _():
        s_part = jnp.sum(acc_sum[...], axis=0, keepdims=True)   # (1, 128)
        c_part = jnp.sum(acc_cnt[...], axis=0, keepdims=True)
        sum_ref[0, 0] = jnp.sum(s_part, axis=1, keepdims=True)  # (1, 1)
        cnt_ref[0, 0] = jnp.sum(c_part, axis=1, keepdims=True)


def _cross_entropy_2d(score, target, *, ignore_label=IGNORE_LABEL,
                      max_rows_per_tile=None):
    """nn.CrossEntropyLoss(ignore_index=ignore_label) on NCHW logits + (N,H,W) labels."""
    N, C, Hs, Ws = score.shape
    _, H, W = target.shape
    if (Hs, Ws) != (H, W):
        # TODO(synk): fuse the bilinear upsample into the kernel (DMA low-res
        # rows per pixel tile + 4-tap lerp on the VPU) to avoid materializing
        # the full-res logits in HBM; for now keep the jax.image.resize glue
        # (matches F.interpolate(mode='bilinear', align_corners=False)).
        # TODO(synk): align_corners=True has no jax.image.resize equivalent.
        score = jax.image.resize(score, (N, C, H, W), method="bilinear",
                                 antialias=False)

    HW = H * W
    target = target.astype(jnp.int32)
    if HW % 128 != 0:
        # Rare path: pad the pixel axis to a lane multiple.  Labels are padded
        # with ignore_label so the extra pixels are masked inside the kernel.
        pad = _round_up(HW, 128) - HW
        score = jnp.pad(score.reshape(N, C, HW), ((0, 0), (0, 0), (0, pad)))
        target = jnp.pad(target.reshape(N, HW), ((0, 0), (0, pad)),
                         constant_values=ignore_label)
        HW += pad

    R = HW // 128
    logits = score.reshape(N, C, R, 128)     # free metadata reshape (NCHW kept)
    labels = target.reshape(N, R, 128)

    itemsize = jnp.dtype(score.dtype).itemsize
    rows = _pick_rows(C, itemsize, R, max_rows=max_rows_per_tile)
    num_tiles = _cdiv(R, rows)
    needs_tail_mask = (R % rows) != 0

    # v7x: when the batch alone cannot feed both TensorCores, split the pixel
    # axis into two "parallel" chunks with per-chunk partial sums.
    splits = 2 if (N == 1 and num_tiles >= 2 and num_tiles % 2 == 0) else 1
    tiles_per_split = num_tiles // splits

    kernel = functools.partial(
        _ce_kernel, ignore_label=ignore_label, num_classes=C, total_rows=R,
        rows_per_tile=rows, tiles_per_split=tiles_per_split,
        needs_tail_mask=needs_tail_mask)

    loss_sum, valid_cnt = pl.pallas_call(
        kernel,
        out_shape=(jax.ShapeDtypeStruct((N, splits, 1, 1), jnp.float32),
                   jax.ShapeDtypeStruct((N, splits, 1, 1), jnp.float32)),
        grid_spec=pltpu.PrefetchScalarGridSpec(
            num_scalar_prefetch=0,
            grid=(N, splits, tiles_per_split),
            in_specs=[
                pl.BlockSpec((1, C, rows, 128),
                             lambda n, s, t: (n, 0, s * tiles_per_split + t, 0)),
                pl.BlockSpec((1, rows, 128),
                             lambda n, s, t: (n, s * tiles_per_split + t, 0)),
            ],
            out_specs=(
                pl.BlockSpec((1, 1, 1, 1), lambda n, s, t: (n, s, 0, 0)),
                pl.BlockSpec((1, 1, 1, 1), lambda n, s, t: (n, s, 0, 0)),
            ),
            scratch_shapes=[pltpu.VMEM((rows, 128), jnp.float32),
                            pltpu.VMEM((rows, 128), jnp.float32)]),
        compiler_params=pltpu.CompilerParams(
            dimension_semantics=("parallel", "parallel", "arbitrary"),
            vmem_limit_bytes=VMEM_LIMIT_BYTES),
    )(logits, labels)

    # mean over non-ignored pixels (weight=None -> uniform class weights)
    return jnp.sum(loss_sum) / jnp.sum(valid_cnt)


def cross_entropy_forward(score, target):
    """CrossEntropy.forward: weighted sum of per-output losses."""
    if NUM_OUTPUTS == 1:
        score = [score]
    weights = BALANCE_WEIGHTS
    assert len(weights) == len(score)
    return sum(w * _cross_entropy_2d(x, target) for w, x in zip(weights, score))


def _reference_loss(score, target):
    """Pure-JAX reference (mirrors nn.CrossEntropyLoss semantics)."""
    N, C, Hs, Ws = score.shape
    _, H, W = target.shape
    if (Hs, Ws) != (H, W):
        score = jax.image.resize(score, (N, C, H, W), method="bilinear",
                                 antialias=False)
    logits = jnp.transpose(score, (0, 2, 3, 1)).reshape(-1, C)
    t = target.reshape(-1)
    valid = t != IGNORE_LABEL
    t_safe = jnp.where(valid, t, 0)
    logp = jax.nn.log_softmax(logits.astype(jnp.float32), axis=-1)
    nll = -jnp.take_along_axis(logp, t_safe[:, None], axis=-1)[:, 0]
    return jnp.sum(jnp.where(valid, nll, 0.0)) / jnp.sum(valid.astype(jnp.float32))


if __name__ == "__main__":
    key = jax.random.PRNGKey(0)
    k_score, k_tgt, k_lo, k_big = jax.random.split(key, 4)

    N, C, H, W = 2, 4, 16, 16
    score = jax.random.normal(k_score, (N, C, H, W), dtype=jnp.float32)
    # labels in [-1, C): -1 exercises ignore_index masking
    target = jax.random.randint(k_tgt, (N, H, W), minval=-1, maxval=C,
                                dtype=jnp.int32)

    loss = jax.block_until_ready(cross_entropy_forward(score, target))
    ref = jax.block_until_ready(_reference_loss(score, target))
    assert jnp.allclose(loss, ref, rtol=1e-5, atol=1e-5), (loss, ref)

    # bf16 logits fed straight into the kernel (f32 math stays inside).
    loss_bf16 = jax.block_until_ready(
        cross_entropy_forward(score.astype(jnp.bfloat16), target))
    ref_bf16 = jax.block_until_ready(
        _reference_loss(score.astype(jnp.bfloat16).astype(jnp.float32), target))
    assert jnp.allclose(loss_bf16, ref_bf16, rtol=1e-5, atol=1e-5), (loss_bf16, ref_bf16)

    # bilinear-resize glue path (logits at half resolution).
    score_lo = jax.random.normal(k_lo, (N, C, H // 2, W // 2), dtype=jnp.float32)
    loss_lo = jax.block_until_ready(cross_entropy_forward(score_lo, target))
    ref_lo = jax.block_until_ready(_reference_loss(score_lo, target))
    assert jnp.allclose(loss_lo, ref_lo, rtol=1e-5, atol=1e-5), (loss_lo, ref_lo)

    # multi-tile path with a ragged last row tile (forced small tile: R=18, rows=8).
    H2 = W2 = 48
    score2 = jax.random.normal(k_big, (N, C, H2, W2), dtype=jnp.float32)
    target2 = jax.random.randint(k_tgt, (N, H2, W2), minval=-1, maxval=C,
                                 dtype=jnp.int32)
    loss2 = jax.block_until_ready(
        _cross_entropy_2d(score2, target2, max_rows_per_tile=8))
    ref2 = jax.block_until_ready(_reference_loss(score2, target2))
    assert jnp.allclose(loss2, ref2, rtol=1e-5, atol=1e-5), (loss2, ref2)

    # N=1 path: pixel axis split into two parallel chunks (v7x 2-TC feed).
    H3 = W3 = 64
    score3 = jax.random.normal(k_big, (1, C, H3, W3), dtype=jnp.float32)
    target3 = jax.random.randint(k_tgt, (1, H3, W3), minval=-1, maxval=C,
                                 dtype=jnp.int32)
    loss3 = jax.block_until_ready(
        _cross_entropy_2d(score3, target3, max_rows_per_tile=8))
    ref3 = jax.block_until_ready(_reference_loss(score3, target3))
    assert jnp.allclose(loss3, ref3, rtol=1e-5, atol=1e-5), (loss3, ref3)

    print("KERNEL_OK")
</pallas_src>

<mosaic_0001>
module attributes {stable_mosaic.version = 11 : i64} {
  func.func @_ce_kernel(%arg0: i32, %arg1: i32, %arg2: i32, %arg3: memref<1x4x2x128xf32, #tpu.memory_space<vmem>>, %arg4: memref<1x2x128xi32, #tpu.memory_space<vmem>>, %arg5: memref<1x1x1x1xf32, #tpu.memory_space<vmem>>, %arg6: memref<1x1x1x1xf32, #tpu.memory_space<vmem>>, %arg7: memref<2x128xf32, #tpu.memory_space<vmem>>, %arg8: memref<2x128xf32, #tpu.memory_space<vmem>>) attributes {dimension_semantics = [#tpu.dimension_semantics<parallel>, #tpu.dimension_semantics<parallel>, #tpu.dimension_semantics<arbitrary>], iteration_bounds = array<i64: 2, 1, 1>, scalar_prefetch = 0 : i64, scratch_operands = 2 : i64, tpu.core_type = #tpu.core_type<tc>, window_params = [{transform_indices = @transform_0, window_bounds = array<i64: 1, 4, 2, 128>}, {transform_indices = @transform_1, window_bounds = array<i64: 1, 2, 128>}, {transform_indices = @transform_2, window_bounds = array<i64: 1, 1, 1, 1>}, {transform_indices = @transform_3, window_bounds = array<i64: 1, 1, 1, 1>}]} {
    %c0_i32 = arith.constant 0 : i32
    %0 = arith.cmpi eq, %arg2, %c0_i32 : i32
    %1 = arith.extui %0 : i1 to i32
    %c0_i32_0 = arith.constant 0 : i32
    %2 = arith.cmpi ne, %1, %c0_i32_0 : i32
    scf.if %2 {
      %cst_40 = arith.constant 0.000000e+00 : f32
      %64 = vector.broadcast %cst_40 : f32 to vector<2x128xf32>
      %c0_41 = arith.constant 0 : index
      %c0_42 = arith.constant 0 : index
      %65 = vector.load %arg7[%c0_41, %c0_42] : memref<2x128xf32, #tpu.memory_space<vmem>>, vector<2x128xf32>
      tpu.vector_store %arg7[%c0_41, %c0_42], %64 {strides = array<i32>} : memref<2x128xf32, #tpu.memory_space<vmem>>, vector<2x128xf32>,
      %cst_43 = arith.constant 0.000000e+00 : f32
      %66 = vector.broadcast %cst_43 : f32 to vector<2x128xf32>
      %c0_44 = arith.constant 0 : index
      %c0_45 = arith.constant 0 : index
      %67 = vector.load %arg8[%c0_44, %c0_45] : memref<2x128xf32, #tpu.memory_space<vmem>>, vector<2x128xf32>
      tpu.vector_store %arg8[%c0_44, %c0_45], %66 {strides = array<i32>} : memref<2x128xf32, #tpu.memory_space<vmem>>, vector<2x128xf32>,
    } else {
    }
    %c0 = arith.constant 0 : index
    %c0_1 = arith.constant 0 : index
    %c0_2 = arith.constant 0 : index
    %3 = vector.load %arg4[%c0, %c0_1, %c0_2] : memref<1x2x128xi32, #tpu.memory_space<vmem>>, vector<1x2x128xi32>
    %4 = vector.shape_cast %3 : vector<1x2x128xi32> to vector<2x128xi32>
    %c-1_i32 = arith.constant -1 : i32
    %5 = vector.broadcast %c-1_i32 : i32 to vector<2x128xi32>
    %6 = arith.cmpi ne, %4, %5 : vector<2x128xi32>
    %c0_3 = arith.constant 0 : index
    %c0_4 = arith.constant 0 : index
    %c0_5 = arith.constant 0 : index
    %c0_6 = arith.constant 0 : index
    %7 = vector.load %arg3[%c0_3, %c0_4, %c0_5, %c0_6] : memref<1x4x2x128xf32, #tpu.memory_space<vmem>>, vector<1x1x2x128xf32>
    %8 = vector.shape_cast %7 : vector<1x1x2x128xf32> to vector<2x128xf32>
    %c0_7 = arith.constant 0 : index
    %c1 = arith.constant 1 : index
    %c0_8 = arith.constant 0 : index
    %c0_9 = arith.constant 0 : index
    %9 = vector.load %arg3[%c0_7, %c1, %c0_8, %c0_9] : memref<1x4x2x128xf32, #tpu.memory_space<vmem>>, vector<1x1x2x128xf32>
    %10 = vector.shape_cast %9 : vector<1x1x2x128xf32> to vector<2x128xf32>
    %11 = arith.maximumf %8, %10 : vector<2x128xf32>
    %c0_10 = arith.constant 0 : index
    %c2 = arith.constant 2 : index
    %c0_11 = arith.constant 0 : index
    %c0_12 = arith.constant 0 : index
    %12 = vector.load %arg3[%c0_10, %c2, %c0_11, %c0_12] : memref<1x4x2x128xf32, #tpu.memory_space<vmem>>, vector<1x1x2x128xf32>
    %13 = vector.shape_cast %12 : vector<1x1x2x128xf32> to vector<2x128xf32>
    %14 = arith.maximumf %11, %13 : vector<2x128xf32>
    %c0_13 = arith.constant 0 : index
    %c3 = arith.constant 3 : index
    %c0_14 = arith.constant 0 : index
    %c0_15 = arith.constant 0 : index
    %15 = vector.load %arg3[%c0_13, %c3, %c0_14, %c0_15] : memref<1x4x2x128xf32, #tpu.memory_space<vmem>>, vector<1x1x2x128xf32>
    %16 = vector.shape_cast %15 : vector<1x1x2x128xf32> to vector<2x128xf32>
    %17 = arith.maximumf %14, %16 : vector<2x128xf32>
    %18 = arith.subf %8, %17 : vector<2x128xf32>
    %19 = math.exp %18 : vector<2x128xf32>
    %c0_i32_16 = arith.constant 0 : i32
    %20 = vector.broadcast %c0_i32_16 : i32 to vector<2x128xi32>
    %21 = arith.cmpi eq, %4, %20 : vector<2x128xi32>
    %cst = arith.constant 0.000000e+00 : f32
    %22 = vector.broadcast %cst : f32 to vector<2x128xf32>
    %23 = arith.select %21, %8, %22 : vector<2x128xi1>, vector<2x128xf32>
    %c0_17 = arith.constant 0 : index
    %c1_18 = arith.constant 1 : index
    %c0_19 = arith.constant 0 : index
    %c0_20 = arith.constant 0 : index
    %24 = vector.load %arg3[%c0_17, %c1_18, %c0_19, %c0_20] : memref<1x4x2x128xf32, #tpu.memory_space<vmem>>, vector<1x1x2x128xf32>
    %25 = vector.shape_cast %24 : vector<1x1x2x128xf32> to vector<2x128xf32>
    %26 = arith.subf %25, %17 : vector<2x128xf32>
    %27 = math.exp %26 : vector<2x128xf32>
    %28 = arith.addf %19, %27 : vector<2x128xf32>
    %c1_i32 = arith.constant 1 : i32
    %29 = vector.broadcast %c1_i32 : i32 to vector<2x128xi32>
    %30 = arith.cmpi eq, %4, %29 : vector<2x128xi32>
    %31 = arith.select %30, %25, %23 : vector<2x128xi1>, vector<2x128xf32>
    %c0_21 = arith.constant 0 : index
    %c2_22 = arith.constant 2 : index
    %c0_23 = arith.constant 0 : index
    %c0_24 = arith.constant 0 : index
    %32 = vector.load %arg3[%c0_21, %c2_22, %c0_23, %c0_24] : memref<1x4x2x128xf32, #tpu.memory_space<vmem>>, vector<1x1x2x128xf32>
    %33 = vector.shape_cast %32 : vector<1x1x2x128xf32> to vector<2x128xf32>
    %34 = arith.subf %33, %17 : vector<2x128xf32>
    %35 = math.exp %34 : vector<2x128xf32>
    %36 = arith.addf %28, %35 : vector<2x128xf32>
    %c2_i32 = arith.constant 2 : i32
    %37 = vector.broadcast %c2_i32 : i32 to vector<2x128xi32>
    %38 = arith.cmpi eq, %4, %37 : vector<2x128xi32>
    %39 = arith.select %38, %33, %31 : vector<2x128xi1>, vector<2x128xf32>
    %c0_25 = arith.constant 0 : index
    %c3_26 = arith.constant 3 : index
    %c0_27 = arith.constant 0 : index
    %c0_28 = arith.constant 0 : index
    %40 = vector.load %arg3[%c0_25, %c3_26, %c0_27, %c0_28] : memref<1x4x2x128xf32, #tpu.memory_space<vmem>>, vector<1x1x2x128xf32>
    %41 = vector.shape_cast %40 : vector<1x1x2x128xf32> to vector<2x128xf32>
    %42 = arith.subf %41, %17 : vector<2x128xf32>
    %43 = math.exp %42 : vector<2x128xf32>
    %44 = arith.addf %36, %43 : vector<2x128xf32>
    %c3_i32 = arith.constant 3 : i32
    %45 = vector.broadcast %c3_i32 : i32 to vector<2x128xi32>
    %46 = arith.cmpi eq, %4, %45 : vector<2x128xi32>
    %47 = arith.select %46, %41, %39 : vector<2x128xi1>, vector<2x128xf32>
    %48 = math.log %44 : vector<2x128xf32>
    %49 = arith.addf %48, %17 : vector<2x128xf32>
    %50 = arith.subf %49, %47 : vector<2x128xf32>
    %c0_29 = arith.constant 0 : index
    %c0_30 = arith.constant 0 : index
    %51 = vector.load %arg7[%c0_29, %c0_30] : memref<2x128xf32, #tpu.memory_space<vmem>>, vector<2x128xf32>
    %cst_31 = arith.constant 0.000000e+00 : f32
    %52 = vector.broadcast %cst_31 : f32 to vector<2x128xf32>
    %53 = arith.select %6, %50, %52 : vector<2x128xi1>, vector<2x128xf32>
    %54 = arith.addf %51, %53 : vector<2x128xf32>
    %c0_32 = arith.constant 0 : index
    %c0_33 = arith.constant 0 : index
    %55 = vector.load %arg7[%c0_32, %c0_33] : memref<2x128xf32, #tpu.memory_space<vmem>>, vector<2x128xf32>
    tpu.vector_store %arg7[%c0_32, %c0_33], %54 {strides = array<i32>} : memref<2x128xf32, #tpu.memory_space<vmem>>, vector<2x128xf32>,
    %c0_34 = arith.constant 0 : index
    %c0_35 = arith.constant 0 : index
    %56 = vector.load %arg8[%c0_34, %c0_35] : memref<2x128xf32, #tpu.memory_space<vmem>>, vector<2x128xf32>
    %57 = arith.extui %6 : vector<2x128xi1> to vector<2x128xi32>
    %58 = arith.sitofp %57 : vector<2x128xi32> to vector<2x128xf32>
    %59 = arith.addf %56, %58 : vector<2x128xf32>
    %c0_36 = arith.constant 0 : index
    %c0_37 = arith.constant 0 : index
    %60 = vector.load %arg8[%c0_36, %c0_37] : memref<2x128xf32, #tpu.memory_space<vmem>>, vector<2x128xf32>
    tpu.vector_store %arg8[%c0_36, %c0_37], %59 {strides = array<i32>} : memref<2x128xf32, #tpu.memory_space<vmem>>, vector<2x128xf32>,
    %c0_i32_38 = arith.constant 0 : i32
    %61 = arith.cmpi eq, %arg2, %c0_i32_38 : i32
    %62 = arith.extui %61 : i1 to i32
    %c0_i32_39 = arith.constant 0 : i32
    %63 = arith.cmpi ne, %62, %c0_i32_39 : i32
    scf.if %63 {
      %c0_40 = arith.constant 0 : index
      %c0_41 = arith.constant 0 : index
      %64 = vector.load %arg7[%c0_40, %c0_41] : memref<2x128xf32, #tpu.memory_space<vmem>>, vector<2x128xf32>
      %cst_42 = arith.constant dense<0.000000e+00> : vector<128xf32>
      %65 = vector.multi_reduction <add>, %64, %cst_42 [0] : vector<2x128xf32> to vector<128xf32>
      %66 = vector.shape_cast %65 : vector<128xf32> to vector<1x128xf32>
      %c0_43 = arith.constant 0 : index
      %c0_44 = arith.constant 0 : index
      %67 = vector.load %arg8[%c0_43, %c0_44] : memref<2x128xf32, #tpu.memory_space<vmem>>, vector<2x128xf32>
      %cst_45 = arith.constant dense<0.000000e+00> : vector<128xf32>
      %68 = vector.multi_reduction <add>, %67, %cst_45 [0] : vector<2x128xf32> to vector<128xf32>
      %69 = vector.shape_cast %68 : vector<128xf32> to vector<1x128xf32>
      %cst_46 = arith.constant dense<0.000000e+00> : vector<1xf32>
      %70 = vector.multi_reduction <add>, %66, %cst_46 [1] : vector<1x128xf32> to vector<1xf32>
      %71 = vector.shape_cast %70 : vector<1xf32> to vector<1x1xf32>
      %c0_47 = arith.constant 0 : index
      %c0_48 = arith.constant 0 : index
      %c0_49 = arith.constant 0 : index
      %c0_50 = arith.constant 0 : index
      %72 = vector.load %arg5[%c0_47, %c0_48, %c0_49, %c0_50] : memref<1x1x1x1xf32, #tpu.memory_space<vmem>>, vector<1x1x1x1xf32>
      %73 = vector.shape_cast %72 : vector<1x1x1x1xf32> to vector<1x1xf32>
      %74 = vector.shape_cast %71 : vector<1x1xf32> to vector<1x1x1x1xf32>
      tpu.vector_store %arg5[%c0_47, %c0_48, %c0_49, %c0_50], %74 {strides = array<i32>} : memref<1x1x1x1xf32, #tpu.memory_space<vmem>>, vector<1x1x1x1xf32>,
      %cst_51 = arith.constant dense<0.000000e+00> : vector<1xf32>
      %75 = vector.multi_reduction <add>, %69, %cst_51 [1] : vector<1x128xf32> to vector<1xf32>
      %76 = vector.shape_cast %75 : vector<1xf32> to vector<1x1xf32>
      %c0_52 = arith.constant 0 : index
      %c0_53 = arith.constant 0 : index
      %c0_54 = arith.constant 0 : index
      %c0_55 = arith.constant 0 : index
      %77 = vector.load %arg6[%c0_52, %c0_53, %c0_54, %c0_55] : memref<1x1x1x1xf32, #tpu.memory_space<vmem>>, vector<1x1x1x1xf32>
      %78 = vector.shape_cast %77 : vector<1x1x1x1xf32> to vector<1x1xf32>
      %79 = vector.shape_cast %76 : vector<1x1xf32> to vector<1x1x1x1xf32>
      tpu.vector_store %arg6[%c0_52, %c0_53, %c0_54, %c0_55], %79 {strides = array<i32>} : memref<1x1x1x1xf32, #tpu.memory_space<vmem>>, vector<1x1x1x1xf32>,
    } else {
    }
    return
  }
  func.func @transform_0(%arg0: i32, %arg1: i32, %arg2: i32) -> (i32, i32, i32, i32) {
    %c1_i32 = arith.constant 1 : i32
    %0 = arith.muli %arg1, %c1_i32 : i32
    %1 = arith.addi %0, %arg2 : i32
    %c0_i32 = arith.constant 0 : i32
    %c0_i32_0 = arith.constant 0 : i32
    %c0_i32_1 = arith.constant 0 : i32
    return %arg0, %c0_i32, %1, %c0_i32_0 : i32, i32, i32, i32
  }
  func.func @transform_1(%arg0: i32, %arg1: i32, %arg2: i32) -> (i32, i32, i32) {
    %c1_i32 = arith.constant 1 : i32
    %0 = arith.muli %arg1, %c1_i32 : i32
    %1 = arith.addi %0, %arg2 : i32
    %c0_i32 = arith.constant 0 : i32
    %c0_i32_0 = arith.constant 0 : i32
    return %arg0, %1, %c0_i32 : i32, i32, i32
  }
  func.func @transform_2(%arg0: i32, %arg1: i32, %arg2: i32) -> (i32, i32, i32, i32) {
    %c0_i32 = arith.constant 0 : i32
    %c0_i32_0 = arith.constant 0 : i32
    %c0_i32_1 = arith.constant 0 : i32
    return %arg0, %arg1, %c0_i32, %c0_i32_0 : i32, i32, i32, i32
  }
  func.func @transform_3(%arg0: i32, %arg1: i32, %arg2: i32) -> (i32, i32, i32, i32) {
    %c0_i32 = arith.constant 0 : i32
    %c0_i32_0 = arith.constant 0 : i32
    %c0_i32_1 = arith.constant 0 : i32
    return %arg0, %arg1, %c0_i32, %c0_i32_0 : i32, i32, i32, i32
  }
}

</mosaic_0001>

<bundles_post_ra>
// kernel: tpu_custom_call.1
= control target key start
LH: loop header
LB: loop body
LE: loop exit
PB: predicated region body
PF: predicated region fallthrough
CT: control target
= control target key end

     0   :  { %9 = vsyncpa [#allocation5], 0  ;;  %s908_s0 = inlined_call_operand.hbm [shape: f32[2,4,2,128], index: 0, kind: input, shape index: {}]   ;;  %s909_s1 = inlined_call_operand.hbm [shape: s32[2,2,128], index: 1, kind: input, shape index: {}]   ;;  %s910_s2 = inlined_call_operand.vmem [shape: f32[2,1,1,1], index: 2, kind: output, shape index: {0}]   ;;  %s911_s3 = inlined_call_operand.vmem [shape: f32[2,1,1,1], index: 3, kind: output, shape index: {1}]  }
   0x1   :  { %11 = vsyncpa [#allocation5 + $0x1], 0 }
   0x2   :  { %12 = vsyncpa [#allocation7], 0 }
   0x3   :  { %14 = vsyncpa [#allocation7 + $0x1], 0  ;;  %s739_s12 = smov 0   ;;  %s741_s13 = smov 0  }
   0x4   :  { %s743_s14 = smov 0   ;;  %s745_s15 = smov 0  }
   0x5   :  { %s747_s16 = smov 0   ;;  %s749_s17 = smov 0  }
   0x6 LB: > { %s506_s18 = sadd.s32 4294967295, %s712_s17   ;;  %s39_s19 = sadd.s32 1, %s708_s16  ;;  %s712_s17 = sphi %s749_s17, %s20_s17   ;;  %s708_s16 = sphi %s747_s16, %s923_s16   ;;  %s704_s15 = sphi %s745_s15, %s922_s15   ;;  %s700_s14 = sphi %s743_s14, %s921_s14   ;;  %s696_s13 = sphi %s741_s13, %s920_s13   ;;  %s692_s12 = sphi %s739_s12, %s919_s12  }
   0x7   : > { %p41_p0 = scmp.ge.s32.totalorder %s39_s19, 2  ;;  %s50_s20 = sadd.s32 1, %s700_s14 }
   0x8   : > { %p57_p1 = scmp.ne.s32.totalorder %s700_s14, %s696_s13  ;;  %p58_p2 = scmp.eq.s32.totalorder %s712_s17, 0 }
   0x9   : > { %s925_s19 = smov (%p41_p0, %s39_s19), 0  ;;  %p63_p4 = scmp.ne.s32.totalorder %s696_s13, %s692_s12 }
   0xa   : > { %p775_p3 = por %p58_p2, %p57_p1  ;;  %s45_s22 = ssub.s32 %s708_s16, %s925_s19 }
   0xb   : > { %p64_p5 = scmp.eq.s32.totalorder %s506_s18, 0  ;;  %p48_p6 = scmp.eq.s32.totalorder %s45_s22, 0 }
   0xc   : > { %p536_p8 = scmp.lt.s32.totalorder %s712_s17, 2  ;;  %s791_s25 = sand.u32 1, %s700_s14  }
   0xd   : > { %p782_p7 = por %p64_p5, %p63_p4  ;;  %s524_s26 = sshll.u32 %s708_s16, 7 }
   0xe   : > { %s788_s24 = scalar_select %p48_p6, %s700_s14, %s50_s20  }
   0xf   : > { %s914_s23 = scalar_select %p782_p7, 1, 0 }
  0x10   : > { %s510_s27 = sshll.u32 %s791_s25, 3  ;;  %s798_s30 = scalar_lea.hbm %s908_s0, %s524_s26 }
  0x11   : > { %s177_s4 = scalar_lea.vmem [#allocation4], %s510_s27  ;;  %p802_p9 = pnand %p536_p8, %p775_p3 }
  0x12   : > { %s186_s5 = sshll.u32 %s177_s4, 4  ;;  %s174_s7 = scalar_lea.sflag [#allocation5], %s791_s25  ;;  %s806_s5 = int_to_ptr.vmem [resolvable:$true] %s186_s5 }
  0x13   : > { %s598_s8 = scalar_lea.hbm %s798_s30, 128  ;;  %p600_p11 = pneg %p802_p9 }
  0x14   : > { %p599_p10 = scmp.ne.s32.totalorder %s798_s30, %s598_s8  ;;  %s603_s11 = scalar_lea.hbm %s908_s0, 256 }
  0x15   : > { %p604_p0 = scmp.lt.u32.totalorder %s798_s30, %s908_s0  ;;  %p605_p1 = scmp.lt.u32.totalorder %s603_s11, %s598_s8 }
  0x16   : > { %p601_p12 = pnand %p600_p11, %p599_p10  ;;  %p607_p3 = scmp.lt.u32.totalorder %s598_s8, %s798_s30 }
  0x17   : > { %p606_p2 = por %p605_p1, %p604_p0 }
  0x18   : > { %p602_p13 = pneg %p601_p12 }
  0x19   : > { %p608_p4 = por %p607_p3, %p606_p2 }
  0x1b   : > { %p609_p5 = pnand %p608_p4, %p602_p13 }
  0x1d   : > { %612 = shalt.err (!%p609_p5)
}
  0x1e   : > { %s613_s20 = scalar_lea.vmem %s806_s5, 128  ;;  %s714_s21 = smov [#allocation4]  }
  0x1f   : > { %p614_p6 = scmp.ne.s32.totalorder %s806_s5, %s613_s20  ;;  %s618_s22 = sshll.u32 %s714_s21, 4  ;;  %s619_s22 = int_to_ptr.vmem [resolvable:$false] %s618_s22 }
  0x20   : > { %s620_s26 = scalar_lea.vmem %s619_s22, 256  ;;  %p621_p12 = scmp.lt.s32.totalorder %s806_s5, %s619_s22 }
  0x21   : > { %p616_p8 = pnand %p614_p6, %p600_p11  ;;  %p622_p0 = scmp.lt.s32.totalorder %s620_s26, %s613_s20 }
  0x23   : > { %p617_p10 = pneg %p616_p8  ;;  %p623_p1 = por %p622_p0, %p621_p12 }
  0x25   : > { %p624_p2 = pnand %p623_p1, %p617_p10 }
  0x27   : > { %627 = shalt.err (!%p624_p2)
}
  0x28   : > { %s715_s27 = smov 32   ;;  %s716_s28 = smov 2  }
  0x29   : > { %532 = dma.hbm_to_vmem [thread:$0]  (!%p802_p9), %s798_s30, 128, %s806_s5, %s174_s7, %s715_s27, %s715_s27, %s716_s28  }
  0x2a   : > { %p515_p13 = scmp.ge.s32.totalorder %s712_s17, 1  ;;  %p214_p3 = scmp.lt.s32.totalorder %s712_s17, 3 }
  0x2b   : > { %s513_s29 = sshll.u32 %s791_s25, 1  ;;  %s514_s8 = sshll.u32 %s708_s16, 5 }
  0x2c   : > { %p839_p4 = pnand %p515_p13, %p214_p3  ;;  %s200_s9 = scalar_lea.vmem [#allocation6], %s513_s29 }
  0x2d   : > { %s209_s10 = sshll.u32 %s200_s9, 4  ;;  %s847_s18 = scalar_lea.hbm %s909_s1, %s514_s8  ;;  %s210_s10 = int_to_ptr.vmem [resolvable:$true] %s209_s10 }
  0x2e   : > { %s916_s4 = scalar_select %p839_p4, 1, 0 }
  0x2f   : > { %s197_s30 = scalar_lea.sflag [#allocation7], %s791_s25  ;;  %s628_s5 = scalar_lea.hbm %s847_s18, 32 }
  0x30   : > { %p629_p5 = scmp.ne.s32.totalorder %s847_s18, %s628_s5  ;;  %s633_s21 = scalar_lea.hbm %s909_s1, 64 }
  0x31   : > { %p634_p10 = scmp.lt.u32.totalorder %s847_s18, %s909_s1  ;;  %p635_p12 = scmp.lt.u32.totalorder %s633_s21, %s628_s5 }
  0x32   : > { %p631_p6 = pnand %p629_p5, %p600_p11  ;;  %p637_p1 = scmp.lt.u32.totalorder %s628_s5, %s847_s18 }
  0x33   : > { %p636_p0 = por %p635_p12, %p634_p10 }
  0x34   : > { %p632_p8 = pneg %p631_p6 }
  0x35   : > { %p638_p2 = por %p637_p1, %p636_p0 }
  0x37   : > { %p639_p13 = pnand %p638_p2, %p632_p8 }
  0x39   : > { %642 = shalt.err (!%p639_p13)
}
  0x3a   : > { %s643_s25 = scalar_lea.vmem %s210_s10, 32  ;;  %s717_s27 = smov [#allocation6]  }
  0x3b   : > { %p644_p3 = scmp.ne.s32.totalorder %s210_s10, %s643_s25  ;;  %s648_s28 = sshll.u32 %s717_s27, 4  ;;  %s649_s28 = int_to_ptr.vmem [resolvable:$false] %s648_s28 }
  0x3c   : > { %s650_s29 = scalar_lea.vmem %s649_s28, 64  ;;  %p651_p7 = scmp.lt.s32.totalorder %s210_s10, %s649_s28 }
  0x3d   : > { %p646_p5 = pnand %p644_p3, %p600_p11  ;;  %p652_p4 = scmp.lt.s32.totalorder %s650_s29, %s643_s25 }
  0x3f   : > { %p647_p6 = pneg %p646_p5  ;;  %p653_p10 = por %p652_p4, %p651_p7 }
  0x41   : > { %p654_p12 = pnand %p653_p10, %p647_p6 }
  0x43   : > { %657 = shalt.err (!%p654_p12)
}
  0x44   : > { %535 = dma.hbm_to_vmem [thread:$0]  (!%p802_p9), %s847_s18, 32, %s210_s10, %s197_s30  }
  0x45   : > { %p917_p8 = scmp.ne.s32.totalorder %s916_s4, 0 }
  0x46   : > { %s220_s8 = sand.u32 (!%p917_p8), 1, %s696_s13   ;;  %p918_p11 = scmp.ne.s32.totalorder (!%p917_p8), %s914_s23, 0 }
  0x47   : > { %218 = sbr.rel (%p917_p8) target bundleno = 299 (0x12b), region = 28  ;;  %s516_s9 = sshll.u32 (!%p917_p8), %s220_s8, 3 }
  0x48   : > { %s221_s11 = scalar_lea.sflag (!%p917_p8), [#allocation5], %s220_s8  ;;  %s224_s12 = scalar_lea.vmem (!%p917_p8), [#allocation4], %s516_s9 }
  0x4e   : > { %683 = dma.done.wait (%p918_p11), %s221_s11, 128  }
  0x4f   : > { %685 = vsyncadd (%p918_p11), %s221_s11, 4294967168  ;;  %s517_s5 = sshll.u32 %s220_s8, 1  ;;  %s230_s7 = scalar_lea.sflag [#allocation7], %s220_s8 }
  0x50   : > { %s233_s6 = scalar_lea.vmem [#allocation6], %s517_s5 }
  0x51   : > { %687 = dma.done.wait (%p918_p11), %s230_s7, 32  }
  0x52   : > { %689 = vsyncadd (%p918_p11), %s230_s7, 4294967264  ;;  %v718_v0 = vmov 0.0   ;;  %v290_v1 = vld [vmem:[%s224_s12] sm:$0x3]  ;;  %v518_v2 = vld [vmem:[%s224_s12 + $0x2] sm:$0x3] }
  0x53   : > { %286 = vst [vmem:[#allocation2] sm:$0x3] %v718_v0  ;;  %287 = vst [vmem:[#allocation3] sm:$0x3] %v718_v0  ;;  %v288_v3 = vld [vmem:[%s233_s6] sm:$0x3]  ;;  %v293_v4 = vmax.f32 %v290_v1, %v518_v2 }
  0x54   : > { %v519_v5 = vld [vmem:[%s224_s12 + $0x4] sm:$0x3]  ;;  %vm289_vm0 = vcmp.ne.s32.totalorder %v288_v3, 4294967295  ;;  %v520_v6 = vld [vmem:[%s224_s12 + $0x6] sm:$0x3]  ;;  %vm303_vm1 = vcmp.eq.s32.totalorder %v288_v3, 0 }
  0x55   : > { %v296_v7 = vmax.f32 %v293_v4, %v519_v5  ;;  %v521_v9 = vsel %vm289_vm0, 1.0, %v718_v0  ;;  %v304_v27 = vsel %vm303_vm1, %v290_v1, 0.0  ;;  %vm309_vm2 = vcmp.eq.s32.totalorder %v288_v3, 1  ;;  %p270_p7 = scmp.lt.s32.totalorder %s704_s15, 1 }
  0x56   : > { %v310_v28 = vsel %vm309_vm2, %v518_v2, %v304_v27  ;;  %vm315_vm3 = vcmp.eq.s32.totalorder %v288_v3, 2  ;;  %vm321_vm4 = vcmp.eq.s32.totalorder %v288_v3, 3  ;;  %vm340_vm5 = vcmask 1041408  }
  0x57   : > { %v299_v11 = vmax.f32 %v296_v7, %v520_v6  ;;  %v316_v29 = vsel %vm315_vm3, %v519_v5, %v310_v28  ;;  %s927_s15 = smov (!%p270_p7, %s704_s15), 1  ;;  %vm358_vm6 = vcmask 0  }
  0x58   : > { %v322_v32 = vsel %vm321_vm4, %v520_v6, %v316_v29  ;;  %s275_s10 = scalar_lea.vmem %s910_s2, %s927_s15  ;;  %s281_s20 = scalar_lea.vmem %s911_s3, %s927_s15 }
  0x59   : > { %v300_v12 = vsub.f32 %v290_v1, %v299_v11  ;;  %v305_v13 = vsub.f32 %v518_v2, %v299_v11  ;;  %v311_v14 = vsub.f32 %v519_v5, %v299_v11  ;;  %v317_v15 = vsub.f32 %v520_v6, %v299_v11 }
  0x5a   : > { %v331_v8 = vld [vmem:[#allocation3] sm:$0x3]  ;;  %v327_v35 = vld [vmem:[#allocation2] sm:$0x3] }
  0x5b   : > { %v334_v10 = vadd.f32 %v521_v9, %v331_v8  ;;  %v301_v16 = vmul.f32 1.442695, %v300_v12  ;;  %v306_v17 = vmul.f32 1.442695, %v305_v13  ;;  %v312_v18 = vmul.f32 1.442695, %v311_v14 }
  0x5c   : > { %v318_v19 = vmul.f32 1.442695, %v317_v15 }
  0x5d   : > { %335 = vst [vmem:[#allocation3] sm:$0x3] %v334_v10  ;;  %588 = vpow2.f32 %v301_v16 }
  0x5e   : > { %590 = vpow2.f32 %v306_v17 }
  0x5f   : > { %592 = vpow2.f32 %v312_v18 }
  0x60   : > { %594 = vpow2.f32 %v318_v19 }
  0x64   : > { %v348_v36 = vld [vmem:[#allocation3] sm:$0x3] }
  0x65   : > { %v349_v39 = vsel %vm340_vm5, %v348_v36, 0.0 }
  0x66   : > { %v350_v40 = vrot.slane %v349_v39, 4 }
  0x67   : > { %v589_v20 = vpop.eup %588 }
  0x68   : > { %v591_v21 = vpop.eup %590  ;;  %v351_v41 = vadd.f32 %v350_v40, %v349_v39 }
  0x69   : > { %v593_v22 = vpop.eup %592  ;;  %v308_v23 = vadd.f32 %v591_v21, %v589_v20 }
  0x6a   : > { %v595_v24 = vpop.eup %594  ;;  %v352_v45 = vrot.slane %v351_v41, 2 }
  0x6b   : > { %v314_v25 = vadd.f32 %v593_v22, %v308_v23 }
  0x6c   : > { %v353_v48 = vadd.f32 %v352_v45, %v351_v41 }
  0x6d   : > { %v320_v26 = vadd.f32 %v595_v24, %v314_v25 }
  0x6e   : > { %v354_v51 = vrot.slane %v353_v48, 1 }
  0x6f   : > { %596 = vlog2.f32 %v320_v26 }
  0x70   : > { %v355_v53 = vadd.f32 %v354_v51, %v353_v48 }
  0x79   : > { %v597_v30 = vpop.eup %596 }
  0x7a   : > { %v324_v31 = vmul.f32 0.6931472, %v597_v30 }
  0x7c   : > { %v325_v33 = vadd.f32 %v324_v31, %v299_v11 }
  0x7e   : > { %v326_v34 = vsub.f32 %v325_v33, %v322_v32 }
  0x80   : > { %v328_v37 = vsel %vm289_vm0, %v326_v34, 0.0 }
  0x81   : > { %v329_v38 = vadd.f32 %v328_v37, %v327_v35 }
  0x83   : > { %330 = vst [vmem:[#allocation2] sm:$0x3] %v329_v38 }
  0x8a   : > { %v339_v42 = vld [vmem:[#allocation2] sm:$0x3] }
  0x8b   : > { %v341_v43 = vsel %vm340_vm5, %v339_v42, 0.0 }
  0x8c   : > { %v342_v44 = vrot.slane %v341_v43, 4 }
  0x8e   : > { %v343_v46 = vadd.f32 %v342_v44, %v341_v43 }
  0x90   : > { %v344_v47 = vrot.slane %v343_v46, 2 }
  0x92   : > { %v345_v49 = vadd.f32 %v344_v47, %v343_v46 }
  0x94   : > { %v346_v50 = vrot.slane %v345_v49, 1 }
  0x96   : > { %v347_v52 = vadd.f32 %v346_v50, %v345_v49 }
  0x98   : > { %356 = vadd.xlane.f32.xlu0 %v347_v52 }
  0x9c   : > { %360 = vadd.xlane.f32.xlu0 %v355_v53 }
 0x125   : > { %v357_v54 = vpop.xlane.xlu0 %356 }
 0x126   : > { %359 = vst.msk [vmem:[%s275_s10] sm:$0x1] %vm358_vm6, %v357_v54 }
 0x129   : > { %v361_v55 = vpop.xlane.xlu0 %360 }
 0x12a   : > { %362 = vst.msk [vmem:[%s281_s20] sm:$0x1] %vm358_vm6, %v361_v55 }
 0x12b PF: > { %s20_s17 = sadd.s32 1, %s712_s17   ;;  %s919_s12 = smov %s696_s13 }
 0x12c   : > { %p17_p9 = scmp.ge.s32.totalorder %s20_s17, 4   ;;  %s920_s13 = smov %s700_s14 }
 0x12d   : > { %s921_s14 = smov %s788_s24  ;;  %s922_s15 = smov %s708_s16 }
 0x12e   : > { %s923_s16 = smov %s925_s19  ;;  %19 = sbr.rel (!%p17_p9) target bundleno = 6 (0x6), region = 104 }
 0x135   :  { %404 = vsyncpa [#allocation5], 1 }
 0x136   :  { %406 = vsyncpa [#allocation5 + $0x1], 1 }
 0x137   :  { %407 = vsyncpa [#allocation7], 1 }
 0x138   :  { %409 = vsyncpa [#allocation7 + $0x1], 1 }

</bundles_post_ra>
